<compile_context>
chip_gen: v6e
topology: v6e:2x2x1
jax: 0.10.0
libtpu: 0.0.40
codegen_flags: <defaults>
</compile_context>

<pallas_src>
import functools

import jax
import jax.numpy as jnp
from jax.experimental import pallas as pl
from jax.experimental.pallas import tpu as pltpu


def _round_up(v, m):
    return (v + m - 1) // m * m


@functools.lru_cache(maxsize=1)
def _vmem_budget_bytes():
    """~80% of the device VMEM capacity (fallback: 64 MiB -> 51 MiB budget)."""
    try:
        cap = int(pltpu.get_tpu_info().vmem_capacity_bytes)
    except Exception:
        cap = 64 * 1024 * 1024
    return int(cap * 0.8)


def _resident_spec(shape, index_map):
    """Grid-invariant block: request single-buffering when the API supports it."""
    if hasattr(pl, "Buffered"):
        try:
            return pl.BlockSpec(shape, index_map, pipeline_mode=pl.Buffered(1))
        except TypeError:
            pass
    return pl.BlockSpec(shape, index_map)


def _time_mlp_kernel(x_ref, t_ref, wf_ref, bf_ref, wt_ref, bt_ref, o_ref, *, out_ch_p):
    # fc: Linear(in_channels -> out_channels); bf16 (or f32) operands, f32 MXU accumulation.
    x_op = x_ref[...].astype(wf_ref.dtype)
    h = jnp.dot(x_op, wf_ref[...], preferred_element_type=jnp.float32)
    h = h + bf_ref[...]                                  # (1, out_p) broadcasts over rows

    # time mlp: SiLU in f32 (VPU/EUP native everywhere), cast to the weight dtype only
    # after the activation, then a single fused Linear(time_dim -> 2*out) MXU dot.
    t32 = t_ref[...].astype(jnp.float32)
    t_act = (t32 * jax.nn.sigmoid(t32)).astype(wt_ref.dtype)
    emb = jnp.dot(t_act, wt_ref[...], preferred_element_type=jnp.float32)
    emb = emb + bt_ref[...]

    # chunk(2, dim=-1): cols [0, out_p) -> scale (+1 already folded into its bias),
    # cols [out_p, 2*out_p) -> shift.  out_ch_p is a multiple of 128 -> lane-aligned views.
    scale = emb[:, :out_ch_p]
    shift = emb[:, out_ch_p:]

    # f32 elementwise epilogue, cast once on the (lane-dense, full-tile) store.
    o_ref[...] = (h * scale + shift).astype(o_ref.dtype)


def pack_time_mlp_params(w_fc, b_fc, w_time, b_time, *, compute_dtype=jnp.bfloat16):
    """One-time parameter packing (call once at init; reuse across forward calls).

    w_fc:   [in_channels, out_channels]   (transposed from PyTorch's [out, in])
    b_fc:   [out_channels]
    w_time: [time_dim, 2*out_channels]    (transposed from PyTorch's [2*out, time_dim])
    b_time: [2*out_channels]

    Returns (w_fc_p, b_fc_p, w_time_p, b_time_p, out_channels) with out_channels padded
    to a multiple of 128 lanes, W_time re-packed so scale|shift are lane-aligned halves,
    '+1' folded into the scale bias, and weights cast to compute_dtype (None -> keep dtype).
    """
    in_ch, out_ch = w_fc.shape
    time_dim = w_time.shape[0]
    assert w_time.shape == (time_dim, 2 * out_ch)
    assert b_fc.shape == (out_ch,) and b_time.shape == (2 * out_ch,)

    out_ch_p = _round_up(out_ch, 128)
    pad_o = out_ch_p - out_ch
    wdt = w_fc.dtype if compute_dtype is None else compute_dtype

    w_fc_p = jnp.pad(w_fc, ((0, 0), (0, pad_o))).astype(wdt)
    b_fc_p = jnp.pad(b_fc.astype(jnp.float32), (0, pad_o)).reshape(1, out_ch_p)

    w_scale = jnp.pad(w_time[:, :out_ch], ((0, 0), (0, pad_o)))
    w_shift = jnp.pad(w_time[:, out_ch:], ((0, 0), (0, pad_o)))
    w_time_p = jnp.concatenate([w_scale, w_shift], axis=-1).astype(wdt)

    # Fold the '+1' of (scale + 1) into the scale bias (padded lanes stay 0).
    b_scale = jnp.pad(b_time[:out_ch].astype(jnp.float32) + 1.0, (0, pad_o))
    b_shift = jnp.pad(b_time[out_ch:].astype(jnp.float32), (0, pad_o))
    b_time_p = jnp.concatenate([b_scale, b_shift]).reshape(1, 2 * out_ch_p)

    return w_fc_p, b_fc_p, w_time_p, b_time_p, out_ch


def _fit_tm(tm, in_ch, time_dim, out_ch_p, x_bytes, t_bytes, w_bytes, out_bytes, budget):
    """Largest row tile <= tm whose full VMEM footprint fits the budget."""
    def footprint(m):
        act = 2 * m * (in_ch * x_bytes + time_dim * t_bytes)          # double-buffered x, t
        out = 2 * m * out_ch_p * out_bytes                            # double-buffered out
        wts = (in_ch * out_ch_p + time_dim * 2 * out_ch_p) * w_bytes  # single-buffered weights
        wts += 3 * out_ch_p * 4                                       # biases (f32)
        # in-kernel f32 intermediates: h, emb, t32/t_act, casted x (upper bound at 4B/elem)
        interm = m * (3 * out_ch_p + 2 * time_dim + in_ch) * 4
        return act + out + wts + interm

    tm = _round_up(max(tm, 8), 8)
    while tm > 64 and footprint(tm) > budget:
        tm //= 2
    return max(tm, 8)


@functools.partial(jax.jit, static_argnames=("out_ch", "tm"))
def time_mlp_block_packed(x, t, w_fc_p, b_fc_p, w_time_p, b_time_p, *, out_ch, tm=1024):
    """Fused TimeMLPBlock forward on pre-packed parameters (see pack_time_mlp_params)."""
    assert x.shape[:-1] == t.shape[:-1], "x and t must share leading (batch) dims"
    lead = x.shape[:-1]
    in_ch = x.shape[-1]
    time_dim = t.shape[-1]
    out_ch_p = w_fc_p.shape[-1]
    assert w_fc_p.shape == (in_ch, out_ch_p)
    assert w_time_p.shape == (time_dim, 2 * out_ch_p)
    assert out_ch_p % 128 == 0 and out_ch <= out_ch_p

    M = 1
    for d in lead:
        M *= d

    x_bytes = jnp.dtype(x.dtype).itemsize
    t_bytes = jnp.dtype(t.dtype).itemsize
    w_bytes = jnp.dtype(w_fc_p.dtype).itemsize
    out_bytes = x_bytes

    # Row tile: fit the generation-aware VMEM budget, then prefer a tile that divides M
    # so x/t stay zero-copy reshapes (no full-HBM pad copy).
    budget = _vmem_budget_bytes()
    tm_fit = _fit_tm(tm, in_ch, time_dim, out_ch_p, x_bytes, t_bytes, w_bytes, out_bytes, budget)
    hi = min(tm_fit, _round_up(max(M, 1), 8))
    tm_eff = None
    for cand in range(hi, 7, -8):
        if M % cand == 0:
            tm_eff = cand
            break
    if tm_eff is None:
        tm_eff = hi
    M_p = _round_up(max(M, 1), tm_eff)

    x2 = x.reshape(M, in_ch)
    t2 = t.reshape(M, time_dim)
    if M_p != M:
        x2 = jnp.pad(x2, ((0, M_p - M), (0, 0)))
        t2 = jnp.pad(t2, ((0, M_p - M), (0, 0)))

    grid = (M_p // tm_eff,)

    cost = pl.CostEstimate(
        flops=int(2 * M * (in_ch * out_ch + time_dim * 2 * out_ch)),
        transcendentals=int(M * time_dim),                 # sigmoid in SiLU (true dims)
        bytes_accessed=int(
            x2.size * x_bytes + t2.size * t_bytes
            + w_fc_p.size * w_bytes + w_time_p.size * w_bytes
            + (b_fc_p.size + b_time_p.size) * 4
            + M_p * out_ch_p * out_bytes),
    )

    full = lambda i: (0, 0)  # grid-invariant weights / biases (fetched once)

    out2 = pl.pallas_call(
        functools.partial(_time_mlp_kernel, out_ch_p=out_ch_p),
        out_shape=jax.ShapeDtypeStruct((M_p, out_ch_p), x.dtype),
        grid_spec=pltpu.PrefetchScalarGridSpec(
            num_scalar_prefetch=0,
            grid=grid,
            in_specs=[
                pl.BlockSpec((tm_eff, in_ch), lambda i: (i, 0)),        # x tile (full in_ch)
                pl.BlockSpec((tm_eff, time_dim), lambda i: (i, 0)),     # t tile (full time_dim)
                _resident_spec((in_ch, out_ch_p), full),                # W_fc       (Buffered(1))
                _resident_spec((1, out_ch_p), full),                    # b_fc       (Buffered(1))
                _resident_spec((time_dim, 2 * out_ch_p), full),         # W_time s|s (Buffered(1))
                _resident_spec((1, 2 * out_ch_p), full),                # b_time s|s (Buffered(1))
            ],
            out_specs=pl.BlockSpec((tm_eff, out_ch_p), lambda i: (i, 0)),
        ),
        compiler_params=pltpu.CompilerParams(
            dimension_semantics=("parallel",),    # row axis shards across v7x's 2 TCs
            vmem_limit_bytes=int(budget),         # generation-aware (v5e/v6e >64 MiB, v7x ~51 MiB)
        ),
        cost_estimate=cost,
    )(x2, t2, w_fc_p, b_fc_p, w_time_p, b_time_p)

    if M_p != M or out_ch_p != out_ch:
        out2 = out2[:M, :out_ch]
    return out2.reshape(*lead, out_ch)


def time_mlp_block(x, t, w_fc, b_fc, w_time, b_time, *, tm=1024, compute_dtype=jnp.bfloat16):
    """Convenience wrapper: pack (per call) then run the fused kernel.

    For repeated forward calls, pack once with pack_time_mlp_params() and call
    time_mlp_block_packed() directly to avoid re-packing the weights every call.
    """
    w_fc_p, b_fc_p, w_time_p, b_time_p, out_ch = pack_time_mlp_params(
        w_fc, b_fc, w_time, b_time, compute_dtype=compute_dtype)
    return time_mlp_block_packed(
        x, t, w_fc_p, b_fc_p, w_time_p, b_time_p, out_ch=out_ch, tm=tm)


def _reference(x, t, w_fc, b_fc, w_time, b_time):
    out_ch = w_fc.shape[-1]
    h = jnp.einsum("...i,io->...o", x, w_fc) + b_fc
    t_act = t * jax.nn.sigmoid(t)
    emb = jnp.einsum("...i,io->...o", t_act, w_time) + b_time
    scale, shift = emb[..., :out_ch], emb[..., out_ch:]
    return h * (scale + 1.0) + shift


if __name__ == "__main__":
    # Small, module-consistent shapes.
    B, S = 2, 8               # leading (batch) dims of x / t
    in_channels = 16
    out_channels = 32
    time_dim = 8

    key = jax.random.PRNGKey(0)
    kx, kt, k1, k2, k3, k4 = jax.random.split(key, 6)

    x = jax.random.normal(kx, (B, S, in_channels), dtype=jnp.float32)
    t = jax.random.normal(kt, (B, S, time_dim), dtype=jnp.float32)

    # Deterministic synthetic parameters (nn.Linear shapes, pre-transposed to [in, out]).
    w_fc = jax.random.normal(k1, (in_channels, out_channels), dtype=jnp.float32) * 0.1
    b_fc = jax.random.normal(k2, (out_channels,), dtype=jnp.float32) * 0.1
    w_time = jax.random.normal(k3, (time_dim, 2 * out_channels), dtype=jnp.float32) * 0.1
    b_time = jax.random.normal(k4, (2 * out_channels,), dtype=jnp.float32) * 0.1

    ref = _reference(x, t, w_fc, b_fc, w_time, b_time)

    # Full-precision path (f32 operands, f32 accumulation): strict check.
    out_f32 = jax.block_until_ready(
        time_mlp_block(x, t, w_fc, b_fc, w_time, b_time, compute_dtype=None))
    assert out_f32.shape == (B, S, out_channels)
    assert jnp.allclose(out_f32, ref, atol=1e-5, rtol=1e-5), "f32 mismatch vs pure-JAX reference"

    # Default fast path: bf16 MXU operands (weights pre-packed once), f32 SiLU/accum/epilogue.
    packed = pack_time_mlp_params(w_fc, b_fc, w_time, b_time)  # bf16 by default
    w_fc_p, b_fc_p, w_time_p, b_time_p, out_ch = packed
    out_bf16 = jax.block_until_ready(
        time_mlp_block_packed(x, t, w_fc_p, b_fc_p, w_time_p, b_time_p, out_ch=out_ch))
    assert out_bf16.shape == (B, S, out_channels)
    assert jnp.allclose(out_bf16, ref, atol=3e-2, rtol=3e-2), "bf16 mismatch vs pure-JAX reference"

    print("KERNEL_OK")
</pallas_src>

<mosaic_0001>
module attributes {stable_mosaic.version = 11 : i64} {
  func.func @_time_mlp_kernel(%arg0: i32, %arg1: memref<16x16xf32, #tpu.memory_space<vmem>>, %arg2: memref<16x8xf32, #tpu.memory_space<vmem>>, %arg3: memref<16x128xf32, #tpu.memory_space<vmem>>, %arg4: memref<1x128xf32, #tpu.memory_space<vmem>>, %arg5: memref<8x256xf32, #tpu.memory_space<vmem>>, %arg6: memref<1x256xf32, #tpu.memory_space<vmem>>, %arg7: memref<16x128xf32, #tpu.memory_space<vmem>>) attributes {dimension_semantics = [#tpu.dimension_semantics<parallel>], iteration_bounds = array<i64: 1>, scalar_prefetch = 0 : i64, scratch_operands = 0 : i64, tpu.core_type = #tpu.core_type<tc>, window_params = [{transform_indices = @transform_0, window_bounds = array<i64: 16, 16>}, {transform_indices = @transform_1, window_bounds = array<i64: 16, 8>}, {pipeline_mode = #tpu.pipeline_mode<synchronous>, transform_indices = @transform_2, window_bounds = array<i64: 16, 128>}, {pipeline_mode = #tpu.pipeline_mode<synchronous>, transform_indices = @transform_3, window_bounds = array<i64: 1, 128>}, {pipeline_mode = #tpu.pipeline_mode<synchronous>, transform_indices = @transform_4, window_bounds = array<i64: 8, 256>}, {pipeline_mode = #tpu.pipeline_mode<synchronous>, transform_indices = @transform_5, window_bounds = array<i64: 1, 256>}, {transform_indices = @transform_6, window_bounds = array<i64: 16, 128>}]} {
    %c0 = arith.constant 0 : index
    %c0_0 = arith.constant 0 : index
    %0 = vector.load %arg1[%c0, %c0_0] : memref<16x16xf32, #tpu.memory_space<vmem>>, vector<16x16xf32>
    %c0_1 = arith.constant 0 : index
    %c0_2 = arith.constant 0 : index
    %1 = vector.load %arg3[%c0_1, %c0_2] : memref<16x128xf32, #tpu.memory_space<vmem>>, vector<16x128xf32>
    %cst = arith.constant dense<0.000000e+00> : vector<16x128xf32>
    %2 = tpu.matmul %0, %1, %cst {dimension_numbers = #tpu.dot_dimension_numbers<[1], [0], [0], [1], [0, 0, 1, 1], [], []>} : vector<16x16xf32>, vector<16x128xf32>, vector<16x128xf32> -> vector<16x128xf32>
    %c0_3 = arith.constant 0 : index
    %c0_4 = arith.constant 0 : index
    %3 = vector.load %arg4[%c0_3, %c0_4] : memref<1x128xf32, #tpu.memory_space<vmem>>, vector<1x128xf32>
    %4 = vector.broadcast %3 : vector<1x128xf32> to vector<16x128xf32>
    %5 = arith.addf %2, %4 : vector<16x128xf32>
    %c0_5 = arith.constant 0 : index
    %c0_6 = arith.constant 0 : index
    %6 = vector.load %arg2[%c0_5, %c0_6] : memref<16x8xf32, #tpu.memory_space<vmem>>, vector<16x8xf32>
    %7 = arith.negf %6 : vector<16x8xf32>
    %8 = math.exp %7 : vector<16x8xf32>
    %cst_7 = arith.constant 1.000000e+00 : f32
    %9 = vector.broadcast %cst_7 : f32 to vector<16x8xf32>
    %10 = arith.addf %9, %8 : vector<16x8xf32>
    %11 = arith.divf %9, %10 : vector<16x8xf32>
    %12 = arith.mulf %6, %11 : vector<16x8xf32>
    %c0_8 = arith.constant 0 : index
    %c0_9 = arith.constant 0 : index
    %13 = vector.load %arg5[%c0_8, %c0_9] : memref<8x256xf32, #tpu.memory_space<vmem>>, vector<8x256xf32>
    %cst_10 = arith.constant dense<0.000000e+00> : vector<16x256xf32>
    %14 = tpu.matmul %12, %13, %cst_10 {dimension_numbers = #tpu.dot_dimension_numbers<[1], [0], [0], [1], [0, 0, 1, 1], [], []>} : vector<16x8xf32>, vector<8x256xf32>, vector<16x256xf32> -> vector<16x256xf32>
    %c0_11 = arith.constant 0 : index
    %c0_12 = arith.constant 0 : index
    %15 = vector.load %arg6[%c0_11, %c0_12] : memref<1x256xf32, #tpu.memory_space<vmem>>, vector<1x256xf32>
    %16 = vector.broadcast %15 : vector<1x256xf32> to vector<16x256xf32>
    %17 = arith.addf %14, %16 : vector<16x256xf32>
    %18 = vector.extract_strided_slice %17 {offsets = [0, 0], sizes = [16, 128], strides = [1, 1]} : vector<16x256xf32> to vector<16x128xf32>
    %19 = vector.extract_strided_slice %17 {offsets = [0, 128], sizes = [16, 128], strides = [1, 1]} : vector<16x256xf32> to vector<16x128xf32>
    %20 = arith.mulf %5, %18 : vector<16x128xf32>
    %21 = arith.addf %20, %19 : vector<16x128xf32>
    %c0_13 = arith.constant 0 : index
    %c0_14 = arith.constant 0 : index
    %22 = vector.load %arg7[%c0_13, %c0_14] : memref<16x128xf32, #tpu.memory_space<vmem>>, vector<16x128xf32>
    tpu.vector_store %arg7[%c0_13, %c0_14], %21 {strides = array<i32>} : memref<16x128xf32, #tpu.memory_space<vmem>>, vector<16x128xf32>,
    return
  }
  func.func @transform_0(%arg0: i32) -> (i32, i32) {
    %c0_i32 = arith.constant 0 : i32
    %c0_i32_0 = arith.constant 0 : i32
    return %arg0, %c0_i32 : i32, i32
  }
  func.func @transform_1(%arg0: i32) -> (i32, i32) {
    %c0_i32 = arith.constant 0 : i32
    %c0_i32_0 = arith.constant 0 : i32
    return %arg0, %c0_i32 : i32, i32
  }
  func.func @transform_2(%arg0: i32) -> (i32, i32) {
    %c0_i32 = arith.constant 0 : i32
    %c0_i32_0 = arith.constant 0 : i32
    %c0_i32_1 = arith.constant 0 : i32
    return %c0_i32, %c0_i32_0 : i32, i32
  }
  func.func @transform_3(%arg0: i32) -> (i32, i32) {
    %c0_i32 = arith.constant 0 : i32
    %c0_i32_0 = arith.constant 0 : i32
    %c0_i32_1 = arith.constant 0 : i32
    return %c0_i32, %c0_i32_0 : i32, i32
  }
  func.func @transform_4(%arg0: i32) -> (i32, i32) {
    %c0_i32 = arith.constant 0 : i32
    %c0_i32_0 = arith.constant 0 : i32
    %c0_i32_1 = arith.constant 0 : i32
    return %c0_i32, %c0_i32_0 : i32, i32
  }
  func.func @transform_5(%arg0: i32) -> (i32, i32) {
    %c0_i32 = arith.constant 0 : i32
    %c0_i32_0 = arith.constant 0 : i32
    %c0_i32_1 = arith.constant 0 : i32
    return %c0_i32, %c0_i32_0 : i32, i32
  }
  func.func @transform_6(%arg0: i32) -> (i32, i32) {
    %c0_i32 = arith.constant 0 : i32
    %c0_i32_0 = arith.constant 0 : i32
    return %arg0, %c0_i32 : i32, i32
  }
}

</mosaic_0001>

<bundles_post_ra>
// kernel: time_mlp_block_packed.1
= control target key start
LH: loop header
LB: loop body
LE: loop exit
PB: predicated region body
PF: predicated region fallthrough
CT: control target
= control target key end

     0   :  { %11 = vsyncpa [#allocation3], 0  ;;  %s483_s0 = inlined_call_operand.hbm [shape: f32[16,16], index: 0, kind: input, shape index: {}]   ;;  %s484_s1 = inlined_call_operand.hbm [shape: f32[16,8], index: 1, kind: input, shape index: {}]   ;;  %s485_s2 = inlined_call_operand.hbm [shape: f32[16,128], index: 2, kind: input, shape index: {}]   ;;  %s486_s3 = inlined_call_operand.vmem [shape: f32[1,128], index: 3, kind: input, shape index: {}]   ;;  %s487_s4 = inlined_call_operand.hbm [shape: f32[8,256], index: 4, kind: input, shape index: {}]   ;;  %s488_s5 = inlined_call_operand.vmem [shape: f32[1,256], index: 5, kind: input, shape index: {}]   ;;  %s489_s6 = inlined_call_operand.vmem [shape: f32[16,128], index: 6, kind: output, shape index: {}]  }
   0x1   :  { %12 = vsyncpa [#allocation5], 0 }
   0x2   :  { %13 = vsyncpa [#allocation8], 0  ;;  %s415_s21 = smov [#allocation4]   ;;  %s416_s23 = smov [#allocation2]  }
   0x3   :  { %s31_s22 = sshll.u32 %s415_s21, 4  ;;  %s19_s24 = sshll.u32 %s416_s23, 4  ;;  %s32_s22 = int_to_ptr.vmem [resolvable:$true] %s31_s22  ;;  %s20_s24 = int_to_ptr.vmem [resolvable:$true] %s19_s24 }
   0x4   :  { %s337_s25 = scalar_lea.vmem %s32_s22, 256  ;;  %p342_p1 = scmp.lt.s32.totalorder %s32_s22, %s32_s22 }
   0x5   :  { %p338_p0 = scmp.ne.s32.totalorder %s32_s22, %s337_s25  ;;  %p343_p2 = scmp.lt.s32.totalorder %s337_s25, %s337_s25 }
   0x7   :  { %p344_p3 = por %p343_p2, %p342_p1 }
   0x9   :  { %p345_p4 = pnand %p344_p3, %p338_p0 }
   0xb   :  { %348 = shalt.err (!%p345_p4)
}
   0xc   :  { %s417_s26 = smov 128   ;;  %s418_s27 = smov 8  }
   0xd   :  { %37 = dma.hbm_to_vmem [thread:$0]  %s484_s1, 256, %s32_s22, [#allocation5], %s417_s26, %s417_s26, %s418_s27  }
   0xe   :  { %s357_s30 = scalar_lea.vmem %s20_s24, 256  ;;  %p362_p6 = scmp.lt.s32.totalorder %s20_s24, %s20_s24 }
   0xf   :  { %p358_p5 = scmp.ne.s32.totalorder %s20_s24, %s357_s30  ;;  %p363_p7 = scmp.lt.s32.totalorder %s357_s30, %s357_s30 }
  0x11   :  { %p364_p8 = por %p363_p7, %p362_p6 }
  0x13   :  { %p365_p9 = pnand %p364_p8, %p358_p5 }
  0x15   :  { %368 = shalt.err (!%p365_p9)
}
  0x16   :  { %25 = dma.hbm_to_vmem [thread:$0]  %s483_s0, 256, %s20_s24, [#allocation3], %s417_s26, %s417_s26, %s418_s27  }
  0x17   :  { %s419_s9 = smov [#allocation6]   ;;  %s420_s11 = smov [#allocation7]  }
  0x18   :  { %s43_s10 = sshll.u32 %s419_s9, 4  ;;  %s58_s12 = sshll.u32 %s420_s11, 4  ;;  %s44_s10 = int_to_ptr.vmem [resolvable:$true] %s43_s10  ;;  %s59_s12 = int_to_ptr.vmem [resolvable:$true] %s58_s12 }
  0x19   :  { %s377_s13 = scalar_lea.vmem %s44_s10, 256  ;;  %p382_p11 = scmp.lt.s32.totalorder %s44_s10, %s44_s10 }
  0x1a   :  { %p378_p10 = scmp.ne.s32.totalorder %s44_s10, %s377_s13  ;;  %p383_p12 = scmp.lt.s32.totalorder %s377_s13, %s377_s13 }
  0x1c   :  { %p384_p13 = por %p383_p12, %p382_p11 }
  0x1e   :  { %p385_p0 = pnand %p384_p13, %p378_p10 }
  0x20   :  { %388 = shalt.err (!%p385_p0)
}
  0x21   :  { %49 = dma.hbm_to_vmem [thread:$0]  %s485_s2, 256, %s44_s10, [#allocation5], %s417_s26, %s417_s26, %s418_s27  }
  0x22   :  { %s397_s15 = scalar_lea.vmem %s59_s12, 256  ;;  %p402_p2 = scmp.lt.s32.totalorder %s59_s12, %s59_s12 }
  0x23   :  { %p398_p1 = scmp.ne.s32.totalorder %s59_s12, %s397_s15  ;;  %p403_p3 = scmp.lt.s32.totalorder %s397_s15, %s397_s15 }
  0x25   :  { %p404_p4 = por %p403_p3, %p402_p2 }
  0x27   :  { %p405_p5 = pnand %p404_p4, %p398_p1 }
  0x29   :  { %408 = shalt.err (!%p405_p5)
}
  0x2a   :  { %61 = dma.hbm_to_vmem [thread:$0]  %s487_s4, 256, %s59_s12, [#allocation8]  }
  0x2b   :  { %409 = dma.done.wait [#allocation3], 256  }
  0x2c   :  { %410 = vsyncadd [#allocation3], 4294967040 }
  0x2d   :  { %411 = dma.done.wait [#allocation5], 512  }
  0x2e   :  { %412 = vsyncadd [#allocation5], 4294966784 }
  0x2f   :  { %413 = dma.done.wait [#allocation8], 256  }
  0x30   :  { %414 = vsyncadd [#allocation8], 4294967040  ;;  %v421_v0 = vmov 0.0   ;;  %vm87_vm0 = vcmask 130048   ;;  %v79_v1 = vld [vmem:[#allocation6 + $0x8] sm:$0xff]  ;;  %v78_v2 = vld [vmem:[#allocation6] sm:$0xff]  ;;  %v189_v19 = vlaneseq }
  0x31   :  { %270 = vmatprep.mubr.f32.mxu1 %v421_v0  ;;  %v76_v3 = vld [vmem:[#allocation2] sm:$0xff]  ;;  %307 = vmatprep.subr.mxu0 %v79_v1  ;;  %v186_v4 = vld [vmem:[#allocation7 + $0x8] sm:$0xff]  ;;  %v185_v5 = vld [vmem:[#allocation7] sm:$0xff]  ;;  %vm199_vm1 = vcmask 64512  }
  0x32   :  { %311 = vmatprep.mubr.msk.f32.mxu0 %vm87_vm0, %v76_v3  ;;  %308 = vmatpush3.msra.mxu0 %v79_v1  ;;  %v77_v6 = vld [vmem:[#allocation2 + $0x8] sm:$0xff]  ;;  %v169_v7 = vld [vmem:[#allocation4] sm:$0xff]  ;;  %v170_v8 = vld [vmem:[#allocation4 + $0x8] sm:$0xff]  ;;  %v190_v20 = vshrl.u32 %v189_v19, 7 }
  0x33   :  { %236 = vmatprep.subr.mxu1 %v186_v4  ;;  %309 = vmatprep.subr.mxu0 %v78_v2  ;;  %v299_v9 = vmul.f32 -1.442695, %v169_v7  ;;  %v300_v10 = vmul.f32 -1.442695, %v170_v8  ;;  %v187_v23 = vld [vmem:[%s488_s5] sm:$0x3] }
  0x34   :  { %237 = vmatpush1.msra.mxu1 %v185_v5  ;;  %310 = vmatpush3.msra.mxu0 %v78_v2  ;;  %v191_v22 = vsub.s32 0, %v190_v20  ;;  %v195_v24 = vsub.s32 1, %v190_v20  ;;  %v296_v25 = vld [vmem:[%s486_s3] ss:$0 sm:$0xff] }
  0x35   :  { %312 = vmatmul.mubr.msk.f32.vlgmr.msra.gmra.mxu0 %vm87_vm0, %v77_v6  ;;  %321 = vpow2.f32 %v299_v9 }
  0x36   :  { %323 = vpow2.f32 %v300_v10  ;;  %v192_v27 = vrot.slane %v187_v23, %v191_v22  ;;  %v196_v29 = vrot.slane %v187_v23, %v195_v24 }
  0x42   :  { %v322_v11 = vpop.eup %321 }
  0x43   :  { %v324_v12 = vpop.eup %323  ;;  %v177_v13 = vadd.f32 1.0, %v322_v11 }
  0x44   :  { %v178_v14 = vadd.f32 1.0, %v324_v12 }
  0x45   :  { %325 = vrcp.f32 %v177_v13 }
  0x46   :  { %327 = vrcp.f32 %v178_v14 }
  0x52   :  { %v326_v15 = vpop.eup %325 }
  0x53   :  { %v328_v16 = vpop.eup %327  ;;  %v183_v17 = vmul.f32 %v326_v15, %v169_v7 }
  0x54   :  { %v184_v18 = vmul.f32 %v328_v16, %v170_v8 }
  0x55   :  { %301 = vmatmul.mubr.msk.f32.vlgmr.msra.gmra.mxu1 %vm199_vm1, %v183_v17 }
  0x56   :  { %276 = vmatprep.mubr.f32.mxu1 %v421_v0 }
  0x59   :  { %302 = vmatmul.mubr.msk.f32.gmra.mxu1 %vm199_vm1, %v184_v18 }
  0xf5   :  { %v313_v21 = vpop.f32.mrf.mxu0 }
  0xf6   :  { %v166_v36 = vadd.f32 %v313_v21, %v296_v25 }
  0xf7   :  { %v160_v26 = vpop.f32.mrf.mxu0 }
  0xf8   :  { %v161_v28 = vadd.f32 %v296_v25, %v160_v26 }
 0x115   :  { %v272_v30 = vpop.f32.mrf.mxu1 }
 0x116   :  { %v273_v31 = vadd.f32 %v272_v30, %v192_v27 }
 0x117   :  { %v274_v32 = vpop.f32.mrf.mxu1 }
 0x118   :  { %v283_v33 = vmul.f32 %v273_v31, %v161_v28  ;;  %v275_v34 = vadd.f32 %v274_v32, %v196_v29 }
 0x119   :  { %v278_v35 = vpop.f32.mrf.mxu1 }
 0x11a   :  { %v285_v37 = vadd.f32 %v283_v33, %v275_v34  ;;  %v279_v38 = vadd.f32 %v278_v35, %v192_v27 }
 0x11b   :  { %v280_v39 = vpop.f32.mrf.mxu1 }
 0x11c   :  { %287 = vst [vmem:[%s489_s6] sm:$0xff] %v285_v37  ;;  %v284_v40 = vmul.f32 %v279_v38, %v166_v36  ;;  %v281_v41 = vadd.f32 %v280_v39, %v196_v29 }
 0x11e   :  { %v286_v42 = vadd.f32 %v284_v40, %v281_v41 }
 0x120   :  { %288 = vst [vmem:[%s489_s6 + $0x8] sm:$0xff] %v286_v42 }
 0x121   :  { %293 = vsyncpa [#allocation3], 1 }
 0x122   :  { %294 = vsyncpa [#allocation5], 1 }
 0x123   :  { %295 = vsyncpa [#allocation8], 1 }

</bundles_post_ra>
